<compile_context>
chip_gen: v7x
topology: tpu7x:2x2x1
jax: 0.10.0
libtpu: 0.0.40
codegen_flags: <defaults>
</compile_context>

<pallas_src>
import jax
import jax.numpy as jnp
from jax.experimental import pallas as pl
from jax.experimental.pallas import tpu as pltpu


def _nop_kernel(x_hbm_ref, o_hbm_ref, flag_ref):
    # The output HBM buffer is aliased to the input HBM buffer, so the
    # identity requires no reads, writes, or DMAs here.  The single SMEM
    # scalar store just keeps the kernel body non-empty; it is never read
    # and costs nothing.
    del x_hbm_ref, o_hbm_ref
    flag_ref[0] = jnp.int32(0)


def nop_layer_forward(x: jax.Array) -> jax.Array:
    """Identity forward (NopLayer) routed through a zero-traffic Pallas call.

    Works for any shape / dtype: no reshapes, no padding, no copy kernel —
    the result aliases the input buffer.
    """
    if x.size == 0:
        # Nothing to do for empty tensors; avoid a degenerate pallas_call.
        return x

    return pl.pallas_call(
        _nop_kernel,
        out_shape=jax.ShapeDtypeStruct(x.shape, x.dtype),
        # Leave the input where it is (HBM); no automatic tile pipelining.
        in_specs=[pl.BlockSpec(memory_space=pl.ANY)],
        out_specs=pl.BlockSpec(memory_space=pl.ANY),
        # Output IS the input buffer -> ~0 bytes of required HBM traffic.
        input_output_aliases={0: 0},
        scratch_shapes=[pltpu.SMEM((1,), jnp.int32)],
        cost_estimate=pl.CostEstimate(flops=0, transcendentals=0, bytes_accessed=0),
    )(x)


if __name__ == "__main__":
    key = jax.random.PRNGKey(0)

    # Small NCHW-style input consistent with NopLayer's use in a conv network.
    x = jax.random.normal(key, (2, 4, 16, 16), dtype=jnp.float32)
    y = nop_layer_forward(x)
    jax.block_until_ready(y)
    assert y.shape == x.shape and y.dtype == x.dtype
    assert bool(jnp.all(y == x))

    # Also exercise an "awkward" shape + sub-32-bit dtype: no padding path,
    # no tiling constraints, since the kernel moves no data.
    x2 = jax.random.normal(key, (3, 5, 7), dtype=jnp.bfloat16)
    y2 = nop_layer_forward(x2)
    jax.block_until_ready(y2)
    assert y2.shape == x2.shape and y2.dtype == x2.dtype
    assert bool(jnp.all(y2 == x2))

    print("KERNEL_OK")
</pallas_src>

<mosaic_0001>
module attributes {stable_mosaic.version = 11 : i64} {
  func.func @_nop_kernel(%arg0: memref<2x4x16x16xf32, #tpu.memory_space<any>>, %arg1: memref<2x4x16x16xf32, #tpu.memory_space<any>>, %arg2: memref<1xi32, #tpu.memory_space<smem>>) attributes {dimension_semantics = [], scalar_prefetch = 0 : i64, scratch_operands = 1 : i64, tpu.core_type = #tpu.core_type<tc>} {
    %c0_i32 = arith.constant 0 : i32
    %c0 = arith.constant 0 : index
    %0 = memref.load %arg2[%c0] : memref<1xi32, #tpu.memory_space<smem>>
    memref.store %c0_i32, %arg2[%c0] : memref<1xi32, #tpu.memory_space<smem>>
    return
  }
}

</mosaic_0001>

<bundles_post_ra>
// kernel: tpu_custom_call.1
= control target key start
LH: loop header
LB: loop body
LE: loop exit
PB: predicated region body
PF: predicated region fallthrough
CT: control target
= control target key end

     0   :  { %s18_s0 = inlined_call_operand.hbm [shape: f32[2,4,16,16], index: 0, kind: input, shape index: {}, may-alias: {0,1}]   ;;  %s19_s1 = inlined_call_operand.hbm [shape: f32[2,4,16,16], index: 1, kind: output, shape index: {}, may-alias: {0,1}]  }

</bundles_post_ra>
